<compile_context>
chip_gen: v7x
topology: tpu7x:2x2x1
jax: 0.10.0
libtpu: 0.0.40
codegen_flags: <defaults>
</compile_context>

<pallas_src>
import functools
import math

import jax
import jax.numpy as jnp
from jax import lax
from jax.experimental import pallas as pl
from jax.experimental.pallas import tpu as pltpu

LANE = 128   # lane tile width (batch-on-lanes layout)


# ----------------------------------------------------------------------------
# Kernel 1: single RHS evaluation (the torch module's forward), lane-dense.
# ----------------------------------------------------------------------------
def fho_rhs_kernel(t_ref, z_ref, u_ref, w1_ref, b1_ref, w2_ref, b2_ref, o_ref,
                   *, c, invQ, A0, invF0):
    """t_ref, z_ref: (1, N); u_ref: (2, N) rows [x0, x1];
    w1/b1/w2_ref: (H, 1); b2_ref: (1, 1); o_ref: (2, N) rows [dxi, ddxi]."""
    t = t_ref[...]                                         # (1, N)
    z = z_ref[...]                                         # (1, N)
    x0 = u_ref[0:1, :]                                     # (1, N) position
    x1 = u_ref[1:2, :]                                     # (1, N) velocity
    w1 = w1_ref[...]                                       # (H, 1)
    b1 = b1_ref[...]                                       # (H, 1)
    w2 = w2_ref[...]                                       # (H, 1)
    b2 = b2_ref[...]                                       # (1, 1)

    drive = jnp.cos(t * c) * invQ                          # (1, N)  EUP cos
    fin = (x0 + z) * A0                                    # (1, N)
    h = jnp.tanh(w1 * fin + b1)                            # (H, N)  VPU bcast + EUP tanh
    f_int = jnp.sum(h * w2, axis=0, keepdims=True) + b2    # (1, N)  XLU sublane reduce
    ddxi = -x1 * invQ - x0 + drive + f_int * invF0         # (1, N)

    o_ref[0:1, :] = x1          # full-row lane-dense stores (no column masking)
    o_ref[1:2, :] = ddxi


def forced_harmonic_oscillator(t, u, z, w1, b1, w2, b2, *, Q, k, A0, f0, fd):
    """Exact forward of the torch module; returns (N, 2) [dxi, ddxi]."""
    N = u.shape[0]
    H = w1.size
    c = float(fd) / float(f0)                # == wd / w0, folded in float64
    invQ = 1.0 / float(Q)
    invF0 = 1.0 / (float(k) * float(A0))

    kernel = functools.partial(fho_rhs_kernel, c=c, invQ=invQ,
                               A0=float(A0), invF0=invF0)

    in_specs = [pl.BlockSpec(memory_space=pltpu.MemorySpace.VMEM)
                for _ in range(7)]
    out_T = pl.pallas_call(
        kernel,
        out_shape=jax.ShapeDtypeStruct((2, N), jnp.float32),
        in_specs=in_specs,
        out_specs=pl.BlockSpec(memory_space=pltpu.MemorySpace.VMEM),
    )(
        t.reshape(1, N).astype(jnp.float32),
        z.reshape(1, N).astype(jnp.float32),
        u.astype(jnp.float32).T,                          # (2, N)
        w1.reshape(H, 1).astype(jnp.float32),
        b1.reshape(H, 1).astype(jnp.float32),
        w2.reshape(H, 1).astype(jnp.float32),
        b2.reshape(1, 1).astype(jnp.float32),
    )
    return out_T.T                                        # (N, 2), module layout


# ----------------------------------------------------------------------------
# Kernel 2: fused fixed-step RK4 integrator (the structural perf lever).
# ----------------------------------------------------------------------------
def fho_rk4_kernel(z_ref, u0_ref, w1_ref, b1_ref, w2_ref, b2_ref, o_ref,
                   *, c, invQ, A0, invF0, t0, dt, n_steps):
    """One 128-lane batch tile; the whole time loop runs inside the kernel so
    pallas_call dispatch is paid once per trajectory, not per RHS eval."""
    z = z_ref[...]                                        # (1, LANE)
    w1 = w1_ref[...]                                      # (H, 1)
    b1 = b1_ref[...]
    w2 = w2_ref[...]
    b2 = b2_ref[...]                                      # (1, 1)

    def rhs(t_scalar, x0, x1):
        ph = jnp.broadcast_to(t_scalar * c, (1, 1))
        drive = jnp.cos(ph) * invQ                                  # (1, 1)
        fin = (x0 + z) * A0                                         # (1, LANE)
        h = jnp.tanh(w1 * fin + b1)                                 # (H, LANE)
        f_int = jnp.sum(h * w2, axis=0, keepdims=True) + b2         # (1, LANE)
        return x1, -x1 * invQ - x0 + drive + f_int * invF0

    def step(i, carry):
        x0, x1 = carry
        tc = t0 + i.astype(jnp.float32) * dt
        k1a, k1b = rhs(tc, x0, x1)
        k2a, k2b = rhs(tc + 0.5 * dt, x0 + 0.5 * dt * k1a, x1 + 0.5 * dt * k1b)
        k3a, k3b = rhs(tc + 0.5 * dt, x0 + 0.5 * dt * k2a, x1 + 0.5 * dt * k2b)
        k4a, k4b = rhs(tc + dt, x0 + dt * k3a, x1 + dt * k3b)
        x0 = x0 + (dt / 6.0) * (k1a + 2.0 * k2a + 2.0 * k3a + k4a)
        x1 = x1 + (dt / 6.0) * (k1b + 2.0 * k2b + 2.0 * k3b + k4b)
        return x0, x1

    x0f, x1f = lax.fori_loop(0, n_steps, step,
                             (u0_ref[0:1, :], u0_ref[1:2, :]))
    o_ref[0:1, :] = x0f
    o_ref[1:2, :] = x1f


def fho_integrate_rk4(u0, z, w1, b1, w2, b2, *, Q, k, A0, f0, fd,
                      t0, dt, n_steps):
    """Integrate du/dt = FHO_rhs(t, u, z) with n_steps of fixed-dt RK4, fully
    fused into a single pallas_call. Returns the final state, shape (N, 2)."""
    N = u0.shape[0]
    H = w1.size
    n_tiles = pl.cdiv(N, LANE)
    NP = n_tiles * LANE

    c = float(fd) / float(f0)
    invQ = 1.0 / float(Q)
    invF0 = 1.0 / (float(k) * float(A0))

    # One-time (outside the fused loop) layout prep: batch on lanes, zero-pad
    # to full 128-lane tiles. Padded lanes evolve independently, sliced off.
    u0T = jnp.zeros((2, NP), jnp.float32).at[:, :N].set(u0.astype(jnp.float32).T)
    zp = jnp.zeros((1, NP), jnp.float32).at[:, :N].set(
        z.reshape(1, N).astype(jnp.float32))

    kernel = functools.partial(fho_rk4_kernel, c=c, invQ=invQ, A0=float(A0),
                               invF0=invF0, t0=float(t0), dt=float(dt),
                               n_steps=int(n_steps))

    # VMEM footprint per tile is a few KiB; well under v7x's 64 MiB, so no
    # vmem_limit_bytes override needed even for much larger batches.
    out_T = pl.pallas_call(
        kernel,
        out_shape=jax.ShapeDtypeStruct((2, NP), jnp.float32),
        grid=(n_tiles,),
        in_specs=[
            pl.BlockSpec((1, LANE), lambda i: (0, i)),    # z
            pl.BlockSpec((2, LANE), lambda i: (0, i)),    # u0 (state)
            pl.BlockSpec((H, 1), lambda i: (0, 0)),       # w1
            pl.BlockSpec((H, 1), lambda i: (0, 0)),       # b1
            pl.BlockSpec((H, 1), lambda i: (0, 0)),       # w2
            pl.BlockSpec((1, 1), lambda i: (0, 0)),       # b2
        ],
        out_specs=pl.BlockSpec((2, LANE), lambda i: (0, i)),
        compiler_params=pltpu.CompilerParams(
            dimension_semantics=("parallel",)),   # v7x: 2 TCs split lane tiles
    )(
        zp, u0T,
        w1.reshape(H, 1).astype(jnp.float32),
        b1.reshape(H, 1).astype(jnp.float32),
        w2.reshape(H, 1).astype(jnp.float32),
        b2.reshape(1, 1).astype(jnp.float32),
    )
    return out_T[:, :N].T


# ----------------------------------------------------------------------------
# Pure-JAX references.
# ----------------------------------------------------------------------------
def reference_forward(t, u, z, w1, b1, w2, b2, *, Q, k, A0, f0, fd):
    """Mirrors the torch forward exactly (same op order, f32 constants)."""
    w0 = jnp.float32(2.0 * math.pi * f0)
    wd = jnp.float32(2.0 * math.pi * fd)
    F0 = jnp.float32(k * A0)
    N = u.shape[0]
    H = w1.size
    x0 = u[:, 0:1]
    x1 = u[:, 1:2]
    tcol = t.reshape(N, 1)
    zcol = z.reshape(N, 1)
    fin = (x0 + zcol) * A0
    h = jnp.tanh(fin * w1.reshape(1, H) + b1.reshape(1, H))
    f_int = jnp.sum(h * w2.reshape(1, H), axis=-1, keepdims=True) + b2.reshape(1, 1)
    ddxi = -x1 / Q - x0 + jnp.cos(wd * tcol / w0) / Q + f_int / F0
    return jnp.concatenate([x1, ddxi], axis=-1)


def reference_rk4(u0, z, w1, b1, w2, b2, *, Q, k, A0, f0, fd, t0, dt, n_steps):
    """Pure-JAX RK4 with the same folded constants / op order as the kernel."""
    N = u0.shape[0]
    H = w1.size
    c = float(fd) / float(f0)
    invQ = 1.0 / float(Q)
    invF0 = 1.0 / (float(k) * float(A0))
    A0f = float(A0)
    dtf = float(dt)
    zr = z.reshape(1, N).astype(jnp.float32)
    w1c = w1.reshape(H, 1).astype(jnp.float32)
    b1c = b1.reshape(H, 1).astype(jnp.float32)
    w2c = w2.reshape(H, 1).astype(jnp.float32)
    b2c = b2.reshape(1, 1).astype(jnp.float32)

    def rhs(t_scalar, x0, x1):
        drive = jnp.cos(jnp.broadcast_to(t_scalar * c, (1, 1))) * invQ
        fin = (x0 + zr) * A0f
        h = jnp.tanh(w1c * fin + b1c)
        f_int = jnp.sum(h * w2c, axis=0, keepdims=True) + b2c
        return x1, -x1 * invQ - x0 + drive + f_int * invF0

    def step(i, carry):
        x0, x1 = carry
        tc = float(t0) + i.astype(jnp.float32) * dtf
        k1a, k1b = rhs(tc, x0, x1)
        k2a, k2b = rhs(tc + 0.5 * dtf, x0 + 0.5 * dtf * k1a, x1 + 0.5 * dtf * k1b)
        k3a, k3b = rhs(tc + 0.5 * dtf, x0 + 0.5 * dtf * k2a, x1 + 0.5 * dtf * k2b)
        k4a, k4b = rhs(tc + dtf, x0 + dtf * k3a, x1 + dtf * k3b)
        x0 = x0 + (dtf / 6.0) * (k1a + 2.0 * k2a + 2.0 * k3a + k4a)
        x1 = x1 + (dtf / 6.0) * (k1b + 2.0 * k2b + 2.0 * k3b + k4b)
        return x0, x1

    x0f, x1f = lax.fori_loop(0, int(n_steps), step,
                             (u0[:, 0].reshape(1, N).astype(jnp.float32),
                              u0[:, 1].reshape(1, N).astype(jnp.float32)))
    return jnp.concatenate([x0f, x1f], axis=0).T


if __name__ == "__main__":
    # Physical parameters (analogous to the torch module __init__ args)
    Q, k, A0, f0, fd = 100.0, 1.0, 1.0, 300e3, 300.5e3
    N, H = 11, 32     # n_samples = 11 (as in training.py), MLP hidden = 32

    key = jax.random.PRNGKey(0)
    kt, ku, kz, kw1, kb1, kw2, kb2 = jax.random.split(key, 7)

    t = jnp.linspace(0.0, 100.0, N, dtype=jnp.float32)          # (N,)
    u = jax.random.normal(ku, (N, 2), dtype=jnp.float32)        # (N, 2)
    z = 0.1 * jax.random.normal(kz, (N,), dtype=jnp.float32)    # (N,)

    # Deterministic F_int parameters (tiny tanh MLP, 1 -> H -> 1)
    w1 = 0.5 * jax.random.normal(kw1, (1, H), dtype=jnp.float32)
    b1 = 0.1 * jax.random.normal(kb1, (H,), dtype=jnp.float32)
    w2 = 0.5 * jax.random.normal(kw2, (H, 1), dtype=jnp.float32)
    b2 = 0.1 * jax.random.normal(kb2, (1,), dtype=jnp.float32)

    # 1) Module forward (single RHS evaluation) — must match the torch math.
    out = forced_harmonic_oscillator(t, u, z, w1, b1, w2, b2,
                                     Q=Q, k=k, A0=A0, f0=f0, fd=fd)
    out = jax.block_until_ready(out)
    ref = reference_forward(t, u, z, w1, b1, w2, b2,
                            Q=Q, k=k, A0=A0, f0=f0, fd=fd)
    assert out.shape == (N, 2) and out.dtype == jnp.float32
    assert jnp.allclose(out, ref, atol=1e-5, rtol=1e-5), "forward mismatch"

    # 2) Fused RK4 integrator: 100 steps (= 400 RHS evals) inside ONE pallas_call.
    t0, dt, n_steps = 0.0, 0.01, 100
    uf = fho_integrate_rk4(u, z, w1, b1, w2, b2, Q=Q, k=k, A0=A0, f0=f0, fd=fd,
                           t0=t0, dt=dt, n_steps=n_steps)
    uf = jax.block_until_ready(uf)
    ref_f = reference_rk4(u, z, w1, b1, w2, b2, Q=Q, k=k, A0=A0, f0=f0, fd=fd,
                          t0=t0, dt=dt, n_steps=n_steps)
    assert uf.shape == (N, 2)
    assert jnp.allclose(uf, ref_f, atol=1e-3, rtol=1e-3), "rk4 mismatch"

    print("KERNEL_OK")
</pallas_src>

<mosaic_0001>
module attributes {stable_mosaic.version = 11 : i64} {
  func.func @fho_rhs_kernel(%arg0: memref<1x11xf32, #tpu.memory_space<vmem>>, %arg1: memref<1x11xf32, #tpu.memory_space<vmem>>, %arg2: memref<2x11xf32, #tpu.memory_space<vmem>>, %arg3: memref<32x1xf32, #tpu.memory_space<vmem>>, %arg4: memref<32x1xf32, #tpu.memory_space<vmem>>, %arg5: memref<32x1xf32, #tpu.memory_space<vmem>>, %arg6: memref<1x1xf32, #tpu.memory_space<vmem>>, %arg7: memref<2x11xf32, #tpu.memory_space<vmem>>) attributes {dimension_semantics = [], scalar_prefetch = 0 : i64, scratch_operands = 0 : i64, tpu.core_type = #tpu.core_type<tc>} {
    %c0 = arith.constant 0 : index
    %c0_0 = arith.constant 0 : index
    %0 = vector.load %arg0[%c0, %c0_0] : memref<1x11xf32, #tpu.memory_space<vmem>>, vector<1x11xf32>
    %c0_1 = arith.constant 0 : index
    %c0_2 = arith.constant 0 : index
    %1 = vector.load %arg1[%c0_1, %c0_2] : memref<1x11xf32, #tpu.memory_space<vmem>>, vector<1x11xf32>
    %c0_3 = arith.constant 0 : index
    %c0_4 = arith.constant 0 : index
    %2 = vector.load %arg2[%c0_3, %c0_4] : memref<2x11xf32, #tpu.memory_space<vmem>>, vector<1x11xf32>
    %c1 = arith.constant 1 : index
    %c0_5 = arith.constant 0 : index
    %3 = vector.load %arg2[%c1, %c0_5] : memref<2x11xf32, #tpu.memory_space<vmem>>, vector<1x11xf32>
    %c0_6 = arith.constant 0 : index
    %c0_7 = arith.constant 0 : index
    %4 = vector.load %arg3[%c0_6, %c0_7] : memref<32x1xf32, #tpu.memory_space<vmem>>, vector<32x1xf32>
    %c0_8 = arith.constant 0 : index
    %c0_9 = arith.constant 0 : index
    %5 = vector.load %arg4[%c0_8, %c0_9] : memref<32x1xf32, #tpu.memory_space<vmem>>, vector<32x1xf32>
    %c0_10 = arith.constant 0 : index
    %c0_11 = arith.constant 0 : index
    %6 = vector.load %arg5[%c0_10, %c0_11] : memref<32x1xf32, #tpu.memory_space<vmem>>, vector<32x1xf32>
    %c0_12 = arith.constant 0 : index
    %c0_13 = arith.constant 0 : index
    %7 = vector.load %arg6[%c0_12, %c0_13] : memref<1x1xf32, #tpu.memory_space<vmem>>, vector<1x1xf32>
    %cst = arith.constant 1.00166667 : f32
    %8 = vector.broadcast %cst : f32 to vector<1x11xf32>
    %9 = arith.mulf %0, %8 : vector<1x11xf32>
    %10 = math.cos %9 : vector<1x11xf32>
    %cst_14 = arith.constant 0.00999999977 : f32
    %11 = vector.broadcast %cst_14 : f32 to vector<1x11xf32>
    %12 = arith.mulf %10, %11 : vector<1x11xf32>
    %13 = arith.addf %2, %1 : vector<1x11xf32>
    %cst_15 = arith.constant 1.000000e+00 : f32
    %14 = vector.broadcast %cst_15 : f32 to vector<1x11xf32>
    %15 = arith.mulf %13, %14 : vector<1x11xf32>
    %16 = vector.broadcast %4 : vector<32x1xf32> to vector<32x11xf32>
    %17 = vector.broadcast %15 : vector<1x11xf32> to vector<32x11xf32>
    %18 = arith.mulf %16, %17 : vector<32x11xf32>
    %19 = vector.broadcast %5 : vector<32x1xf32> to vector<32x11xf32>
    %20 = arith.addf %18, %19 : vector<32x11xf32>
    %21 = math.tanh %20 : vector<32x11xf32>
    %22 = vector.broadcast %6 : vector<32x1xf32> to vector<32x11xf32>
    %23 = arith.mulf %21, %22 : vector<32x11xf32>
    %cst_16 = arith.constant dense<0.000000e+00> : vector<11xf32>
    %24 = vector.multi_reduction <add>, %23, %cst_16 [0] : vector<32x11xf32> to vector<11xf32>
    %25 = vector.shape_cast %24 : vector<11xf32> to vector<1x11xf32>
    %26 = vector.broadcast %7 : vector<1x1xf32> to vector<1x11xf32>
    %27 = arith.addf %25, %26 : vector<1x11xf32>
    %cst_17 = arith.constant 0.000000e+00 : f32
    %28 = vector.broadcast %cst_17 : f32 to vector<1x11xf32>
    %29 = arith.subf %28, %3 : vector<1x11xf32>
    %cst_18 = arith.constant 0.00999999977 : f32
    %30 = vector.broadcast %cst_18 : f32 to vector<1x11xf32>
    %31 = arith.mulf %29, %30 : vector<1x11xf32>
    %32 = arith.subf %31, %2 : vector<1x11xf32>
    %33 = arith.addf %32, %12 : vector<1x11xf32>
    %cst_19 = arith.constant 1.000000e+00 : f32
    %34 = vector.broadcast %cst_19 : f32 to vector<1x11xf32>
    %35 = arith.mulf %27, %34 : vector<1x11xf32>
    %36 = arith.addf %33, %35 : vector<1x11xf32>
    %c0_20 = arith.constant 0 : index
    %c0_21 = arith.constant 0 : index
    %37 = vector.load %arg7[%c0_20, %c0_21] : memref<2x11xf32, #tpu.memory_space<vmem>>, vector<1x11xf32>
    tpu.vector_store %arg7[%c0_20, %c0_21], %3 {strides = array<i32>} : memref<2x11xf32, #tpu.memory_space<vmem>>, vector<1x11xf32>,
    %c1_22 = arith.constant 1 : index
    %c0_23 = arith.constant 0 : index
    %38 = vector.load %arg7[%c1_22, %c0_23] : memref<2x11xf32, #tpu.memory_space<vmem>>, vector<1x11xf32>
    tpu.vector_store %arg7[%c1_22, %c0_23], %36 {strides = array<i32>} : memref<2x11xf32, #tpu.memory_space<vmem>>, vector<1x11xf32>,
    return
  }
}

</mosaic_0001>

<bundles_post_ra>
// kernel: tpu_custom_call.1
= control target key start
LH: loop header
LB: loop body
LE: loop exit
PB: predicated region body
PF: predicated region fallthrough
CT: control target
= control target key end

     0   :  { %s469_s0 = inlined_call_operand.vmem [shape: f32[1,11], index: 0, kind: input, shape index: {}]   ;;  %s470_s1 = inlined_call_operand.vmem [shape: f32[1,11], index: 1, kind: input, shape index: {}]   ;;  %s471_s2 = inlined_call_operand.vmem [shape: f32[2,11], index: 2, kind: input, shape index: {}]   ;;  %s472_s3 = inlined_call_operand.vmem [shape: f32[32,1], index: 3, kind: input, shape index: {}]   ;;  %s473_s4 = inlined_call_operand.vmem [shape: f32[32,1], index: 4, kind: input, shape index: {}]   ;;  %s474_s5 = inlined_call_operand.vmem [shape: f32[32,1], index: 5, kind: input, shape index: {}]   ;;  %s475_s6 = inlined_call_operand.<no memory space> [shape: f32[1,1], index: 6, kind: input, shape index: {}]   ;;  %s476_s7 = inlined_call_operand.hbm [shape: f32[2,11], index: 7, kind: output, shape index: {}]  }
   0x1   :  { %v12_v0 = vstv %s475_s6 }
   0x2   :  { %13 = vst [vmem:[#allocation2] sm:$0x1] %v12_v0 }
   0x3   :  { %v35_v1 = vld [vmem:[%s472_s3 + $0x10] sm:$0xff]  ;;  %v33_v2 = vld [vmem:[%s472_s3] sm:$0xff]  ;;  %v332_v3 = vmov 0   ;;  %v34_v5 = vld [vmem:[%s472_s3 + $0x8] sm:$0xff] }
   0x4   :  { %295 = vset.pattern.permute.xlu1 %v332_v3  ;;  %294 = vset.pattern.permute.xlu0 %v332_v3  ;;  %v37_v4 = vld [vmem:[%s473_s4] sm:$0xff] }
   0x5   :  { %164 = vperm.xlu1 %295, %v35_v1   ;;  %154 = vperm.xlu0 %294, %v33_v2   ;;  %v29_v6 = vld [vmem:[%s469_s0] sm:$0x1] }
   0x9   :  { %182 = vperm.xlu1 %295, %v37_v4   ;;  %159 = vperm.xlu0 %294, %v34_v5  }
   0xa   :  { %14 = vsyncpa [#allocation4], 0  ;;  %v36_v7 = vld [vmem:[%s472_s3 + $0x18] sm:$0xff]  ;;  %v38_v8 = vld [vmem:[%s473_s4 + $0x8] sm:$0xff]  ;;  %v404_v9 = vmul.f32 1.0016667, %v29_v6 }
   0xb   :  { %v40_v11 = vld [vmem:[%s473_s4 + $0x18] sm:$0xff]  ;;  %v39_v12 = vld [vmem:[%s473_s4 + $0x10] sm:$0xff]  ;;  %v42_v16 = vld [vmem:[%s474_s5 + $0x8] sm:$0xff]  ;;  %v333_v26 = vmov 683565275   ;;  %vm261_vm6 = vcmask 81920  }
   0xc   :  { %v50_v10 = vand.u32 2139095040, %v404_v9  ;;  %v47_v15 = vand.u32 2147483647, %v404_v9  ;;  %v41_v17 = vld [vmem:[%s474_s5] sm:$0xff]  ;;  %v44_v19 = vld [vmem:[%s474_s5 + $0x18] sm:$0xff]  ;;  %v43_v22 = vld [vmem:[%s474_s5 + $0x10] sm:$0xff]  ;;  %vm139_vm13 = vweird.f32 %v404_v9 }
   0xd   :  { %169 = vperm.xlu1 %295, %v36_v7   ;;  %187 = vperm.xlu0 %294, %v38_v8   ;;  %v334_v28 = vmov 2475754826   ;;  %v335_v30 = vmov 2131351028   ;;  %v336_v33 = vmov 2102212464  }
   0xe   :  { %v51_v13 = vshrl.u32 %v50_v10, 23  ;;  %v54_v20 = vand.u32 8388607, %v47_v15  ;;  %v337_v35 = vmov 920167782   ;;  %vm49_vm8 = vcmp.lt.s32.totalorder %v404_v9, 0 }
   0xf   :  { %v45_v37 = vld [vmem:[#allocation2] sm:$0x1]  ;;  %v338_v43 = vmov 1326507024   ;;  %vm48_vm9 = vcmp.le.f32.partialorder %v47_v15, 0.7853982 }
  0x10   :  { %v278_v14 = vadd.s32 4294967169, %v51_v13  ;;  %v55_v32 = vor.u32 8388608, %v54_v20  ;;  %v32_v13 = vld [vmem:[%s471_s2 + $0x1] sm:$0x1]  ;;  %vm232_vm14 = vcmask 89088  }
  0x11   :  { %197 = vperm.xlu1 %295, %v40_v11   ;;  %192 = vperm.xlu0 %294, %v39_v12   ;;  %262 = vst.msk [vmem:[#allocation3] sm:$0x1] %vm261_vm6, %v32_v13 }
  0x12   :  { %v57_v18 = vadd.s32 1, %v278_v14  ;;  %v95_v50 = vshll.u32 %v55_v32, 8 }
  0x14   :  { %vm58_vm0 = vcmp.gt.s32.totalorder %v57_v18, 0 }
  0x15   :  { %215 = vperm.xlu1 %295, %v42_v16   ;;  %210 = vperm.xlu0 %294, %v41_v17   ;;  %v59_v21 = vsel %vm58_vm0, %v57_v18, 0 }
  0x16   :  { %v61_v23 = vand.u32 31, %v59_v21  ;;  %v60_v24 = vshrl.u32 %v59_v21, 5 }
  0x18   :  { %v62_v25 = vsub.s32 32, %v61_v23  ;;  %v64_v27 = vshll.u32 %v333_v26, %v61_v23  ;;  %v67_v29 = vshll.u32 %v334_v28, %v61_v23  ;;  %v70_v31 = vshll.u32 %v335_v30, %v61_v23 }
  0x19   :  { %225 = vperm.xlu1 %295, %v44_v19   ;;  %220 = vperm.xlu0 %294, %v43_v22   ;;  %v73_v34 = vshll.u32 %v336_v33, %v61_v23  ;;  %v76_v36 = vshll.u32 %v337_v35, %v61_v23  ;;  %vm79_vm1 = vcmp.lt.s32.totalorder %v60_v24, 1  ;;  %vm82_vm2 = vcmp.lt.s32.totalorder %v60_v24, 4 }
  0x1a   :  { %v63_v38 = vshrl.u32 %v333_v26, %v62_v25  ;;  %v65_v39 = vshrl.u32 %v334_v28, %v62_v25  ;;  %v68_v40 = vshrl.u32 %v335_v30, %v62_v25  ;;  %v71_v41 = vshrl.u32 %v336_v33, %v62_v25 }
  0x1b   :  { %v74_v42 = vshrl.u32 %v337_v35, %v62_v25  ;;  %v77_v44 = vshrl.u32 %v338_v43, %v62_v25  ;;  %vm81_vm3 = vcmp.lt.s32.totalorder %v60_v24, 3  ;;  %vm80_vm4 = vcmp.lt.s32.totalorder %v60_v24, 2 }
  0x1c   :  { %v66_v45 = vor.u32 %v65_v39, %v64_v27  ;;  %v69_v46 = vor.u32 %v68_v40, %v67_v29  ;;  %v72_v47 = vor.u32 %v71_v41, %v70_v31 }
  0x1d   :  { %248 = vperm.xlu0 %294, %v45_v37   ;;  %v75_v48 = vor.u32 %v74_v42, %v73_v34  ;;  %v78_v49 = vor.u32 %v77_v44, %v76_v36  ;;  %v31_v44 = vld [vmem:[%s471_s2] sm:$0x1] }
  0x1e   :  { %v83_v51 = vsel %vm79_vm1, %v63_v38, %v66_v45  ;;  %v84_v52 = vsel %vm82_vm2, %v72_v47, 2102212464  ;;  %v87_v53 = vsel %vm79_vm1, %v66_v45, %v69_v46  ;;  %v91_v56 = vsel %vm79_vm1, %v69_v46, %v72_v47 }
  0x1f   :  { %v85_v54 = vsel %vm81_vm3, %v69_v46, %v84_v52  ;;  %v88_v55 = vsel %vm82_vm2, %v75_v48, 920167782  ;;  %v92_v57 = vsel %vm82_vm2, %v78_v49, 1326507024  ;;  %v256_v38 = vsub.f32 0.0, %v32_v13 }
  0x20   :  { %v89_v58 = vsel %vm81_vm3, %v72_v47, %v88_v55  ;;  %v93_v59 = vsel %vm81_vm3, %v75_v48, %v92_v57  ;;  %v86_v60 = vsel %vm80_vm4, %v83_v51, %v85_v54  ;;  %v172_v51 = vlaneseq }
  0x21   :  { %v90_v61 = vsel %vm80_vm4, %v87_v53, %v89_v58  ;;  %v94_v62 = vsel %vm80_vm4, %v91_v56, %v93_v59  ;;  %v102_v3 = vmul.u32 %v95_v50, %v86_v60  ;;  %v257_v42 = vmul.f32 0.01, %v256_v38  ;;  %v30_v53 = vld [vmem:[%s470_s1] sm:$0x1]  ;;  %s339_s1 = smov [#allocation3]  }
  0x22   :  { %v431_v63 = vmul.u32.u64.low %v95_v50, %v94_v62  ;;  %v432_v0 = vmul.u32.u64.high %v95_v50, %v94_v62, %v431_v63  ;;  %v434_v1 = vmul.u32.u64.low %v95_v50, %v90_v61  ;;  %v435_v2 = vmul.u32.u64.high %v95_v50, %v90_v61, %v434_v1  ;;  %s270_s2 = sshll.u32 %s339_s1, 4  ;;  %s271_s2 = int_to_ptr.vmem [resolvable:$true] %s270_s2 }
  0x23   :  { %v258_v47 = vsub.f32 %v257_v42, %v31_v44  ;;  %v173_v52 = vshrl.u32 %v172_v51, 7  ;;  %v151_v55 = vadd.f32 %v31_v44, %v30_v53  ;;  %s308_s30 = scalar_lea.vmem %s271_s2, 32  ;;  %p313_p1 = scmp.lt.s32.totalorder %s271_s2, %s271_s2 }
  0x24   :  { %vm104_vm5 = vc.u32 %v432_v0, %v434_v1  ;;  %v105_v4 = vadd.s32 1, %v435_v2  ;;  %v103_v18 = vadd.s32 %v434_v1, %v432_v0  ;;  %p309_p0 = scmp.ne.s32.totalorder %s271_s2, %s308_s30  ;;  %p314_p2 = scmp.lt.s32.totalorder %s308_s30, %s308_s30 }
  0x25   :  { %v174_v54 = vsub.s32 0, %v173_v52 }
  0x26   :  { %v106_v5 = vsel %vm104_vm5, %v105_v4, %v435_v2  ;;  %p315_p3 = por %p314_p2, %p313_p1 }
  0x27   :  { %v107_v6 = vadd.s32 %v106_v5, %v102_v3  ;;  %v175_v56 = vrot.slane %v151_v55, %v174_v54 }
  0x28   :  { %p316_p4 = pnand %p315_p3, %p309_p0 }
  0x29   :  { %v108_v7 = vadd.s32 536870912, %v107_v6 }
  0x2b   :  { %v109_v8 = vshrl.u32 %v108_v7, 30 }
  0x2d   :  { %v110_v10 = vshll.u32 %v109_v8, 30  ;;  %v133_v32 = vsub.s32 4, %v109_v8 }
  0x2f   :  { %v111_v11 = vsub.s32 %v107_v6, %v110_v10  ;;  %v134_v35 = vsel %vm49_vm8, %v133_v32, %v109_v8 }
  0x30   :  { %v136_v36 = vsel %vm48_vm9, 0, %v134_v35 }
  0x31   :  { %v113_v12 = vsub.s32 0, %v111_v11  ;;  %v140_v37 = vand.u32 3, %v136_v36 }
  0x33   :  { %v279_v14 = vmin.u32 %v113_v12, %v111_v11  ;;  %vm145_vm10 = vcmp.eq.s32.totalorder %v140_v37, 2  ;;  %vm142_vm11 = vcmp.eq.s32.totalorder %v140_v37, 0  ;;  %vm141_vm12 = vcmp.lt.s32.totalorder %v140_v37, 2 }
  0x35   :  { %v115_v16 = vclz %v279_v14 }
  0x37   :  { %v280_v17 = vadd.s32 4294967294, %v115_v16 }
  0x39   :  { %vm281_vm7 = vcmp.lt.s32.totalorder %v280_v17, 0 }
  0x3a   :  { %v118_v19 = vsel %vm281_vm7, 0, %v280_v17 }
  0x3b   :  { %v119_v20 = vsub.s32 32, %v118_v19  ;;  %v120_v21 = vshll.u32 %v111_v11, %v118_v19  ;;  %v123_v22 = vsub.s32 4294967266, %v118_v19 }
  0x3d   :  { %v121_v23 = vshrl.u32 %v103_v18, %v119_v20  ;;  %v124_v24 = vadd.s32 127, %v123_v22 }
  0x3f   :  { %v122_v25 = vor.u32 %v121_v23, %v120_v21  ;;  %v125_v26 = vshll.u32 %v124_v24, 23 }
  0x41   :  { %v126_v27 = vor.u32 4788187, %v125_v26  ;;  %v129_v28 = vcvt.s32.f32 %v122_v25 }
  0x43   :  { %v127_v29 = vand.u32 2147483647, %v126_v27 }
  0x45   :  { %v130_v30 = vmul.f32 %v129_v28, %v127_v29 }
  0x47   :  { %v131_v31 = vxor.u32 2147483648, %v130_v30 }
  0x49   :  { %v132_v33 = vsel %vm49_vm8, %v131_v31, %v130_v30 }
  0x4a   :  { %v135_v34 = vsel %vm48_vm9, %v404_v9, %v132_v33 }
  0x4b   :  { %296 = vcosq.f32 %v135_v34 }
  0x4c   :  { %298 = vsinq.f32 %v135_v34 }
  0x55   :  { %v297_v39 = vpop.eup %296 }
  0x56   :  { %v299_v40 = vpop.eup %298  ;;  %v146_v41 = vxor.u32 2147483648, %v297_v39 }
  0x57   :  { %v143_v43 = vxor.u32 2147483648, %v299_v40 }
  0x58   :  { %v147_v15 = vsel %vm145_vm10, %v146_v41, %v299_v40 }
  0x59   :  { %v144_v45 = vsel %vm142_vm11, %v297_v39, %v143_v43 }
  0x5a   :  { %v148_v46 = vsel %vm141_vm12, %v144_v45, %v147_v15 }
  0x5b   :  { %v149_v48 = vsel %vm139_vm13, nan, %v148_v46 }
  0x5c   :  { %v150_v49 = vmul.f32 0.01, %v149_v48 }
  0x5e   :  { %v259_v50 = vadd.f32 %v258_v47, %v150_v49 }
  0x84   :  { %v165_v9 = vpop.permute.xlu1 %164  ;;  %v155_v57 = vpop.permute.xlu0 %154 }
  0x85   :  { %v176_v58 = vmul.f32 %v175_v56, %v155_v57  ;;  %v178_v2 = vmul.f32 %v175_v56, %v165_v9 }
  0x88   :  { %v183_v59 = vpop.permute.xlu1 %182  ;;  %v160_v60 = vpop.permute.xlu0 %159 }
  0x89   :  { %v200_v61 = vadd.f32 %v183_v59, %v176_v58  ;;  %v177_v62 = vmul.f32 %v175_v56, %v160_v60 }
  0x8b   :  { %300 = vtanh.f32 %v200_v61 }
  0x8c   :  { %v170_v63 = vpop.permute.xlu1 %169  ;;  %v188_v0 = vpop.permute.xlu0 %187 }
  0x8d   :  { %v201_v1 = vadd.f32 %v188_v0, %v177_v62  ;;  %v179_v3 = vmul.f32 %v175_v56, %v170_v63 }
  0x8f   :  { %302 = vtanh.f32 %v201_v1 }
  0x90   :  { %v198_v4 = vpop.permute.xlu1 %197  ;;  %v193_v5 = vpop.permute.xlu0 %192 }
  0x91   :  { %v203_v6 = vadd.f32 %v198_v4, %v179_v3  ;;  %v202_v7 = vadd.f32 %v193_v5, %v178_v2 }
  0x93   :  { %304 = vtanh.f32 %v203_v6 }
  0x94   :  { %306 = vtanh.f32 %v202_v7  ;;  %v216_v10 = vpop.permute.xlu1 %215  ;;  %v211_v11 = vpop.permute.xlu0 %210 }
  0x95   :  { %v301_v8 = vpop.eup %300 }
  0x96   :  { %v228_v14 = vmul.f32 %v301_v8, %v211_v11 }
  0x98   :  { %v226_v19 = vpop.permute.xlu1 %225  ;;  %v221_v20 = vpop.permute.xlu0 %220  ;;  %v233_v21 = vsel %vm232_vm14, %v228_v14, 0.0 }
  0x99   :  { %v303_v12 = vpop.eup %302 }
  0x9a   :  { %v229_v13 = vmul.f32 %v303_v12, %v216_v10 }
  0x9c   :  { %v234_v17 = vsel %vm232_vm14, %v229_v13, 0.0  ;;  %v249_v33 = vpop.permute.xlu0 %248 }
  0x9d   :  { %v305_v16 = vpop.eup %304  ;;  %v235_v24 = vadd.f32 %v234_v17, %v233_v21  ;;  %v254_v36 = vrot.slane %v249_v33, %v174_v54 }
  0x9e   :  { %v307_v18 = vpop.eup %306  ;;  %v231_v22 = vmul.f32 %v305_v16, %v226_v19 }
  0x9f   :  { %v230_v23 = vmul.f32 %v307_v18, %v221_v20 }
  0xa0   :  { %v238_v27 = vsel %vm232_vm14, %v231_v22, 0.0 }
  0xa1   :  { %v236_v25 = vsel %vm232_vm14, %v230_v23, 0.0 }
  0xa2   :  { %v237_v26 = vadd.f32 %v236_v25, %v235_v24 }
  0xa4   :  { %v239_v28 = vadd.f32 %v238_v27, %v237_v26 }
  0xa6   :  { %v240_v29 = vrot.slane %v239_v28, 4 }
  0xa8   :  { %v241_v30 = vadd.f32 %v240_v29, %v239_v28 }
  0xaa   :  { %v242_v31 = vrot.slane %v241_v30, 2 }
  0xac   :  { %v243_v32 = vadd.f32 %v242_v31, %v241_v30 }
  0xae   :  { %v244_v34 = vrot.slane %v243_v32, 1 }
  0xb0   :  { %v245_v35 = vadd.f32 %v244_v34, %v243_v32 }
  0xb2   :  { %v255_v37 = vadd.f32 %v254_v36, %v245_v35 }
  0xb4   :  { %v260_v38 = vadd.f32 %v259_v50, %v255_v37 }
  0xb6   :  { %263 = vst.msk [vmem:[#allocation3 + $0x1] sm:$0x1] %vm261_vm6, %v260_v38 }
  0xb7   :  { %319 = shalt.err (!%p316_p4)
}
  0xb8   :  { %s320_s6 = scalar_lea.hbm %s476_s7, 32 }
  0xb9   :  { %p321_p5 = scmp.ne.s32.totalorder %s476_s7, %s320_s6  ;;  %p324_p6 = scmp.lt.u32.totalorder %s320_s6, %s476_s7 }
  0xbb   :  { %p326_p7 = pnand %p324_p6, %p321_p5 }
  0xbd   :  { %329 = shalt.err (!%p326_p7)
}
  0xbe   :  { %273 = dma.vmem_to_hbm [thread:$0]  %s271_s2, 32, %s476_s7, [#allocation4]  }
  0xbf   :  { %330 = dma.done.wait [#allocation4], 32  }
  0xc0   :  { %331 = vsyncadd [#allocation4], 4294967264 }
  0xc1   :  { %277 = vsyncpa [#allocation4], 1 }

</bundles_post_ra>
